<compile_context>
chip_gen: v7x
topology: tpu7x:2x2x1
jax: 0.10.0
libtpu: 0.0.40
codegen_flags: <defaults>
</compile_context>

<pallas_src>
import functools

import jax
import jax.numpy as jnp
from jax.experimental import pallas as pl
from jax.experimental.pallas import tpu as pltpu


def _round_up(a, b):
    return (a + b - 1) // b * b


def _cdiv(a, b):
    return -(-a // b)


# ---------------------------------------------------------------------------
# Kernel 1: per-instance phi (1x1 Conv == Linear) + ReLU, fused per-cluster
# segment sum into a per-split partial-sum output block.
# ---------------------------------------------------------------------------
def _phi_cluster_sum_kernel(cid_ref, x_ref, wphi_ref, bphi_ref, psum_ref, *,
                            num_clusters, tiles_per_split, tile_n, n_valid,
                            compute_dtype):
    t = pl.program_id(1)

    @pl.when(t == 0)
    def _init():
        psum_ref[...] = jnp.zeros_like(psum_ref)

    # Global (unclamped) tile index.  Phantom tiles (start >= n_valid) only
    # exist when the tile count is odd and split across cores; their rows are
    # zeroed below so they contribute nothing.
    g = pl.program_id(0) * tiles_per_split + t
    start = g * tile_n

    # phi: per-instance Linear(dim_in, dim_hid) + ReLU.  bf16 operands on the
    # MXU, f32 accumulation; the cast from the stored dtype happens in VMEM so
    # x is read from HBM exactly once, in its original dtype.
    h = jnp.dot(x_ref[...].astype(compute_dtype), wphi_ref[...],
                preferred_element_type=jnp.float32)                 # (TN, D) f32
    h = jnp.maximum(h + bphi_ref[...], 0.0)

    # Zero rows past the end of the bag (ragged last tile / phantom tile);
    # this also squashes any garbage (NaN/Inf) read from the padded block.
    rows = jax.lax.broadcasted_iota(jnp.int32, (tile_n, 1), 0) + start
    h = jnp.where(rows < n_valid, h, 0.0)

    # Fused AdaptiveAvgPool1d numerator: one-hot cluster mask @ h.  The 0/1
    # mask is exact in bf16; accumulation stays f32 -> native MXU path.
    cid = cid_ref[...]                                               # (1, TN) i32
    clusters = jax.lax.broadcasted_iota(jnp.int32, (num_clusters, tile_n), 0)
    mask = (clusters == cid).astype(compute_dtype)                   # (C, TN)
    psum_ref[...] += jnp.dot(mask, h.astype(compute_dtype),
                             preferred_element_type=jnp.float32)     # (C, D) f32


# ---------------------------------------------------------------------------
# Kernel 2: cluster means -> attention MLP -> gated attention -> softmax ->
# attention pooling.  Runs once on tiny (C, dim_hid) data.
# ---------------------------------------------------------------------------
def _attention_head_kernel(psum_ref, counts_ref, w1_ref, b1_ref, wa_ref, ba_ref,
                           wb_ref, bb_ref, wc_ref, bc_ref, out_ref):
    # Reduce per-core partial sums, then form cluster means (exact divide).
    sums = jnp.sum(psum_ref[...], axis=0)                            # (C, D) f32
    counts = counts_ref[...]                                         # (C, 1) f32
    # empty cluster -> zeros (matches torch.zeros((1, dim_hid, 1, 1)) branch)
    h_cluster = jnp.where(counts > 0.0, sums / jnp.maximum(counts, 1.0), 0.0)

    # attention_net: Linear + ReLU (+ Dropout == identity in eval)
    h_path = jnp.dot(h_cluster.astype(w1_ref.dtype), w1_ref[...],
                     preferred_element_type=jnp.float32) + b1_ref[...]
    h_path = jnp.maximum(h_path, 0.0)                                # (C, D) f32

    # Attn_Net_Gated: a = tanh(Wa h), b = sigmoid(Wb h), A = Wc (a*b) + bc
    a = jnp.tanh(jnp.dot(h_path.astype(wa_ref.dtype), wa_ref[...],
                         preferred_element_type=jnp.float32) + ba_ref[...])
    b = jax.nn.sigmoid(jnp.dot(h_path.astype(wb_ref.dtype), wb_ref[...],
                               preferred_element_type=jnp.float32) + bb_ref[...])
    # attention_c: Linear(dim_hid, 1) as a lane reduction (wc is (1, dim_hid))
    A = jnp.sum((a * b) * wc_ref[...], axis=1, keepdims=True) + bc_ref[...]  # (C,1)

    # softmax over clusters (exact), then H = A^T @ h_path
    A = A - jnp.max(A, axis=0, keepdims=True)
    e = jnp.exp(A)
    A = e / jnp.sum(e, axis=0, keepdims=True)
    out_ref[...] = jnp.sum(A * h_path, axis=0, keepdims=True)        # (1, D)


def deepattmisl_forward(x_path, cluster_id, params, *, num_clusters=8,
                        tile_n=None, compute_dtype=jnp.bfloat16):
    """x_path: (1, N, dim_in); cluster_id: (N,) int; returns H: (1, dim_hid)."""
    f32 = jnp.float32
    x = x_path.reshape(x_path.shape[-2], x_path.shape[-1])   # metadata only, no copy
    n, dim_in = x.shape
    dim_hid = params["w1"].shape[1]
    x_item = jnp.dtype(x.dtype).itemsize
    c_item = jnp.dtype(compute_dtype).itemsize

    # ---- tile size: big enough (~2-8 MiB of x per tile) to amortize the
    # ~0.35us per-grid-step overhead, small enough to fit v7x's 64 MiB VMEM.
    if tile_n is None:
        per_row = (2 * dim_in * x_item + 2 * 4          # x + cid, double-buffered
                   + dim_in * c_item                    # bf16 cast of x
                   + dim_hid * (4 + c_item)             # h (f32) + h (bf16)
                   + num_clusters * (4 + c_item))       # cluster iota + mask
        tn = (24 << 20) // per_row
        tn = max(512, min(8192, (tn // 512) * 512))
        tn = max(128, min(tn, _round_up(n, 128)))       # don't over-tile tiny bags
    else:
        tn = int(tile_n)
    assert tn % 128 == 0, "tile_n must be a multiple of 128 (lane width)"

    num_tiles = _cdiv(n, tn)
    # v7x megacore: split the N reduction across the two TensorCores via a
    # leading "parallel" grid axis (per-core partial-sum output blocks).
    # On single-core chips (v5e/v6e) this axis just iterates sequentially.
    num_splits = 2 if num_tiles >= 2 else 1
    tiles_per_split = _cdiv(num_tiles, num_splits)
    last_tile = num_tiles - 1

    cid = cluster_id.reshape(1, -1).astype(jnp.int32)                # (1, N)
    # Exact per-cluster member counts (AdaptiveAvgPool1d denominator).
    counts = jnp.bincount(cluster_id.reshape(-1).astype(jnp.int32),
                          length=num_clusters).reshape(num_clusters, 1).astype(f32)

    wphi = params["wphi"].astype(compute_dtype)
    bphi = params["bphi"].reshape(1, dim_hid).astype(f32)

    # ---- VMEM budget: double-buffered blocks + the in-kernel f32/bf16 h and
    # mask temporaries, clamped per-generation via get_tpu_info().
    tile_bytes = tn * dim_in * x_item + tn * 4
    const_bytes = int(wphi.size) * c_item + dim_hid * 4
    out_bytes = num_clusters * dim_hid * 4
    interm_bytes = (tn * dim_in * c_item                    # bf16 cast of x
                    + tn * dim_hid * (4 + c_item)           # h f32 + h bf16
                    + num_clusters * tn * (4 + c_item))     # cluster iota + mask
    vmem_needed = 2 * (tile_bytes + const_bytes + out_bytes) + interm_bytes + (4 << 20)
    try:
        vmem_cap = int(pltpu.get_tpu_info().vmem_capacity_bytes)
    except Exception:
        vmem_cap = 64 << 20                                  # conservative (v7x)
    vmem_limit = int(min(max(vmem_needed, 16 << 20), (vmem_cap * 3) // 4))

    def tile_idx(c, t):
        # Clamp phantom tiles (possible only when num_tiles is odd) onto the
        # last real tile; the in-kernel row mask zeroes their contribution.
        return jnp.minimum(c * tiles_per_split + t, last_tile)

    kernel = functools.partial(
        _phi_cluster_sum_kernel, num_clusters=num_clusters,
        tiles_per_split=tiles_per_split, tile_n=tn, n_valid=n,
        compute_dtype=compute_dtype)

    psums = pl.pallas_call(
        kernel,
        grid=(num_splits, tiles_per_split),
        in_specs=[pl.BlockSpec((1, tn), lambda c, t: (0, tile_idx(c, t))),
                  pl.BlockSpec((tn, dim_in), lambda c, t: (tile_idx(c, t), 0)),
                  pl.BlockSpec(wphi.shape, lambda c, t: (0, 0)),
                  pl.BlockSpec(bphi.shape, lambda c, t: (0, 0))],
        out_specs=pl.BlockSpec((None, num_clusters, dim_hid), lambda c, t: (c, 0, 0)),
        out_shape=jax.ShapeDtypeStruct((num_splits, num_clusters, dim_hid), f32),
        compiler_params=pltpu.CompilerParams(
            dimension_semantics=("parallel", "arbitrary"),
            vmem_limit_bytes=vmem_limit),
    )(cid, x, wphi, bphi)
    # TODO(synk): pipeline_mode=pl.Buffered(3) on the x/cid specs (v6e DMA-jitter
    # smoothing) once per-generation VMEM headroom detection is plumbed through.

    # ---- tiny finalize kernel -------------------------------------------
    w1 = params["w1"].astype(compute_dtype)
    wa = params["wa"].astype(compute_dtype)
    wb = params["wb"].astype(compute_dtype)
    b1 = params["b1"].reshape(1, dim_hid).astype(f32)
    ba = params["ba"].reshape(1, dim_hid).astype(f32)
    bb = params["bb"].reshape(1, dim_hid).astype(f32)
    wc = params["wc"].reshape(1, dim_hid).astype(f32)
    bc = params["bc"].reshape(1, 1).astype(f32)
    consts = (w1, b1, wa, ba, wb, bb, wc, bc)

    def full_spec(a):
        nd = a.ndim
        return pl.BlockSpec(a.shape, lambda i, _nd=nd: (0,) * _nd)

    return pl.pallas_call(
        _attention_head_kernel,
        grid=(1,),
        in_specs=[full_spec(psums), full_spec(counts)] + [full_spec(a) for a in consts],
        out_specs=pl.BlockSpec((1, dim_hid), lambda i: (0, 0)),
        out_shape=jax.ShapeDtypeStruct((1, dim_hid), f32),
        compiler_params=pltpu.CompilerParams(dimension_semantics=("arbitrary",)),
    )(psums, counts, *consts)


def deepattmisl_reference(x_path, cluster_id, params, *, num_clusters=8,
                          compute_dtype=jnp.bfloat16):
    """Pure-JAX reference mirroring the PyTorch forward (eval mode), with the
    same bf16-operand / f32-accumulation matmul policy as the kernels."""
    f32 = jnp.float32
    dim_hid = params["w1"].shape[1]

    def mm(a, w):
        return jnp.dot(a.astype(compute_dtype), w.astype(compute_dtype),
                       preferred_element_type=f32)

    x = x_path.reshape(x_path.shape[-2], x_path.shape[-1])
    cid = cluster_id.reshape(-1)
    h = jnp.maximum(mm(x, params["wphi"]) + params["bphi"].reshape(1, dim_hid), 0.0)
    mask = (jnp.arange(num_clusters)[:, None] == cid[None, :]).astype(f32)
    sums = mm(mask, h)                          # bf16 segment-sum, f32 accumulation
    counts = mask.sum(axis=1, keepdims=True)
    h_cluster = jnp.where(counts > 0, sums / jnp.maximum(counts, 1.0), 0.0)
    h_path = jnp.maximum(mm(h_cluster, params["w1"]) + params["b1"].reshape(1, dim_hid), 0.0)
    a = jnp.tanh(mm(h_path, params["wa"]) + params["ba"].reshape(1, dim_hid))
    b = jax.nn.sigmoid(mm(h_path, params["wb"]) + params["bb"].reshape(1, dim_hid))
    A = (a * b) @ params["wc"].reshape(dim_hid, 1) + params["bc"].reshape(1, 1)
    A = jax.nn.softmax(A.T, axis=1)
    return A @ h_path


def init_params(key, dim_in, dim_hid):
    ks = jax.random.split(key, 6)

    def lin(k, fi, fo):
        return jax.random.uniform(k, (fi, fo), jnp.float32,
                                  -1.0 / jnp.sqrt(fi), 1.0 / jnp.sqrt(fi))

    return {
        "wphi": lin(ks[0], dim_in, dim_hid), "bphi": jnp.zeros((1, dim_hid), jnp.float32),
        "w1":   lin(ks[1], dim_hid, dim_hid), "b1":  jnp.zeros((1, dim_hid), jnp.float32),
        "wa":   lin(ks[2], dim_hid, dim_hid), "ba":  jnp.zeros((1, dim_hid), jnp.float32),
        "wb":   lin(ks[3], dim_hid, dim_hid), "bb":  jnp.zeros((1, dim_hid), jnp.float32),
        # attention_c weight stored as a row vector (1, dim_hid) for lane reduction
        "wc":   lin(ks[4], dim_hid, 1).reshape(1, dim_hid),
        "bc":   jnp.zeros((1, 1), jnp.float32),
    }


if __name__ == "__main__":
    # Small but lane-dense demo shapes (dim_in / dim_hid multiples of 128).
    N, DIM_IN, DIM_HID, NUM_CLUSTERS = 300, 128, 128, 8

    key = jax.random.PRNGKey(0)
    k_x, k_cid, k_p = jax.random.split(key, 3)

    # x_path is the "bag" of N patch features (batch dim of 1, as in the module).
    x_path = jax.random.normal(k_x, (1, N, DIM_IN), jnp.float32)
    # ids in [0, 7) so cluster 7 is empty -> exercises the zero-cluster branch
    cluster_id = jax.random.randint(k_cid, (N,), 0, NUM_CLUSTERS - 1, jnp.int32)
    params = init_params(k_p, DIM_IN, DIM_HID)

    # tile_n=128 -> 3 real tiles split across 2 "cores" (2x2 grid, one ragged
    # tile and one phantom tile), exercising init/accumulate, the ragged row
    # mask, the clamped phantom tile and the two-partial finalize.  Production
    # bags should leave tile_n=None (auto ~4 MiB x tiles, e.g. 8192 rows).
    out = deepattmisl_forward(x_path, cluster_id, params,
                              num_clusters=NUM_CLUSTERS, tile_n=128)
    out = jax.block_until_ready(out)

    ref = deepattmisl_reference(x_path, cluster_id, params,
                                num_clusters=NUM_CLUSTERS)
    assert out.shape == (1, DIM_HID)
    # bf16 matmul operands throughout -> compare at 2e-2.
    assert jnp.allclose(out, ref, atol=2e-2, rtol=2e-2), "mismatch vs JAX reference"

    print("KERNEL_OK")
</pallas_src>

<mosaic_0001>
module attributes {stable_mosaic.version = 11 : i64} {
  func.func @_phi_cluster_sum_kernel(%arg0: i32, %arg1: i32, %arg2: memref<1x128xi32, #tpu.memory_space<vmem>>, %arg3: memref<128x128xf32, #tpu.memory_space<vmem>>, %arg4: memref<128x128xbf16, #tpu.memory_space<vmem>>, %arg5: memref<1x128xf32, #tpu.memory_space<vmem>>, %arg6: memref<1x8x128xf32, #tpu.memory_space<vmem>>) attributes {dimension_semantics = [#tpu.dimension_semantics<parallel>, #tpu.dimension_semantics<arbitrary>], iteration_bounds = array<i64: 2, 2>, scalar_prefetch = 0 : i64, scratch_operands = 0 : i64, tpu.core_type = #tpu.core_type<tc>, window_params = [{transform_indices = @transform_0, window_bounds = array<i64: 1, 128>}, {transform_indices = @transform_1, window_bounds = array<i64: 128, 128>}, {pipeline_mode = #tpu.pipeline_mode<synchronous>, transform_indices = @transform_2, window_bounds = array<i64: 128, 128>}, {pipeline_mode = #tpu.pipeline_mode<synchronous>, transform_indices = @transform_3, window_bounds = array<i64: 1, 128>}, {transform_indices = @transform_4, window_bounds = array<i64: 1, 8, 128>}]} {
    %c0_i32 = arith.constant 0 : i32
    %0 = arith.cmpi eq, %arg1, %c0_i32 : i32
    %1 = arith.extui %0 : i1 to i32
    %c0_i32_0 = arith.constant 0 : i32
    %2 = arith.cmpi ne, %1, %c0_i32_0 : i32
    scf.if %2 {
      %cst_17 = arith.constant 0.000000e+00 : f32
      %39 = vector.broadcast %cst_17 : f32 to vector<8x128xf32>
      %c0_18 = arith.constant 0 : index
      %c0_19 = arith.constant 0 : index
      %c0_20 = arith.constant 0 : index
      %40 = vector.load %arg6[%c0_18, %c0_19, %c0_20] : memref<1x8x128xf32, #tpu.memory_space<vmem>>, vector<1x8x128xf32>
      %41 = vector.shape_cast %40 : vector<1x8x128xf32> to vector<8x128xf32>
      %42 = vector.shape_cast %39 : vector<8x128xf32> to vector<1x8x128xf32>
      tpu.vector_store %arg6[%c0_18, %c0_19, %c0_20], %42 {strides = array<i32>} : memref<1x8x128xf32, #tpu.memory_space<vmem>>, vector<1x8x128xf32>,
    } else {
    }
    %c2_i32 = arith.constant 2 : i32
    %3 = arith.muli %arg0, %c2_i32 : i32
    %4 = arith.addi %3, %arg1 : i32
    %c128_i32 = arith.constant 128 : i32
    %5 = arith.muli %4, %c128_i32 : i32
    %c0 = arith.constant 0 : index
    %c0_1 = arith.constant 0 : index
    %6 = vector.load %arg3[%c0, %c0_1] : memref<128x128xf32, #tpu.memory_space<vmem>>, vector<128x128xf32>
    %7 = arith.truncf %6 : vector<128x128xf32> to vector<128x128xbf16>
    %c0_2 = arith.constant 0 : index
    %c0_3 = arith.constant 0 : index
    %8 = vector.load %arg4[%c0_2, %c0_3] : memref<128x128xbf16, #tpu.memory_space<vmem>>, vector<128x128xbf16>
    %cst = arith.constant dense<0.000000e+00> : vector<128x128xf32>
    %9 = tpu.matmul %7, %8, %cst {dimension_numbers = #tpu.dot_dimension_numbers<[1], [0], [0], [1], [0, 0, 1, 1], [], []>} : vector<128x128xbf16>, vector<128x128xbf16>, vector<128x128xf32> -> vector<128x128xf32>
    %c0_4 = arith.constant 0 : index
    %c0_5 = arith.constant 0 : index
    %10 = vector.load %arg5[%c0_4, %c0_5] : memref<1x128xf32, #tpu.memory_space<vmem>>, vector<1x128xf32>
    %11 = vector.broadcast %10 : vector<1x128xf32> to vector<128x128xf32>
    %12 = arith.addf %9, %11 : vector<128x128xf32>
    %cst_6 = arith.constant 0.000000e+00 : f32
    %13 = vector.broadcast %cst_6 : f32 to vector<128x128xf32>
    %14 = arith.maximumf %12, %13 : vector<128x128xf32>
    %15 = tpu.iota {dimensions = array<i32: 0>} : vector<128x1xi32>
    %16 = vector.broadcast %5 : i32 to vector<128x1xi32>
    %17 = arith.addi %15, %16 : vector<128x1xi32>
    %c300_i32 = arith.constant 300 : i32
    %18 = vector.broadcast %c300_i32 : i32 to vector<128x1xi32>
    %19 = arith.cmpi slt, %17, %18 : vector<128x1xi32>
    %cst_7 = arith.constant 0.000000e+00 : f32
    %20 = vector.shape_cast %19 : vector<128x1xi1> to vector<128x1xi1>
    %21 = vector.broadcast %20 : vector<128x1xi1> to vector<128x128xi1>
    %22 = vector.broadcast %cst_7 : f32 to vector<128x128xf32>
    %23 = arith.select %21, %14, %22 : vector<128x128xi1>, vector<128x128xf32>
    %c0_8 = arith.constant 0 : index
    %c0_9 = arith.constant 0 : index
    %24 = vector.load %arg2[%c0_8, %c0_9] : memref<1x128xi32, #tpu.memory_space<vmem>>, vector<1x128xi32>
    %25 = tpu.iota {dimensions = array<i32: 0>} : vector<8x128xi32>
    %26 = vector.broadcast %24 : vector<1x128xi32> to vector<8x128xi32>
    %27 = arith.cmpi eq, %25, %26 : vector<8x128xi32>
    %28 = arith.extui %27 : vector<8x128xi1> to vector<8x128xi32>
    %29 = arith.sitofp %28 : vector<8x128xi32> to vector<8x128xf32>
    %30 = arith.truncf %29 : vector<8x128xf32> to vector<8x128xbf16>
    %c0_10 = arith.constant 0 : index
    %c0_11 = arith.constant 0 : index
    %c0_12 = arith.constant 0 : index
    %31 = vector.load %arg6[%c0_10, %c0_11, %c0_12] : memref<1x8x128xf32, #tpu.memory_space<vmem>>, vector<1x8x128xf32>
    %32 = vector.shape_cast %31 : vector<1x8x128xf32> to vector<8x128xf32>
    %33 = arith.truncf %23 : vector<128x128xf32> to vector<128x128xbf16>
    %cst_13 = arith.constant dense<0.000000e+00> : vector<8x128xf32>
    %34 = tpu.matmul %30, %33, %cst_13 {dimension_numbers = #tpu.dot_dimension_numbers<[1], [0], [0], [1], [0, 0, 1, 1], [], []>} : vector<8x128xbf16>, vector<128x128xbf16>, vector<8x128xf32> -> vector<8x128xf32>
    %35 = arith.addf %32, %34 : vector<8x128xf32>
    %c0_14 = arith.constant 0 : index
    %c0_15 = arith.constant 0 : index
    %c0_16 = arith.constant 0 : index
    %36 = vector.load %arg6[%c0_14, %c0_15, %c0_16] : memref<1x8x128xf32, #tpu.memory_space<vmem>>, vector<1x8x128xf32>
    %37 = vector.shape_cast %36 : vector<1x8x128xf32> to vector<8x128xf32>
    %38 = vector.shape_cast %35 : vector<8x128xf32> to vector<1x8x128xf32>
    tpu.vector_store %arg6[%c0_14, %c0_15, %c0_16], %38 {strides = array<i32>} : memref<1x8x128xf32, #tpu.memory_space<vmem>>, vector<1x8x128xf32>,
    return
  }
  func.func @transform_0(%arg0: i32, %arg1: i32) -> (i32, i32) {
    %c2_i32 = arith.constant 2 : i32
    %0 = arith.muli %arg0, %c2_i32 : i32
    %1 = arith.addi %0, %arg1 : i32
    %c2_i32_0 = arith.constant 2 : i32
    %2 = arith.minsi %1, %c2_i32_0 : i32
    %c0_i32 = arith.constant 0 : i32
    %c0_i32_1 = arith.constant 0 : i32
    return %c0_i32, %2 : i32, i32
  }
  func.func @transform_1(%arg0: i32, %arg1: i32) -> (i32, i32) {
    %c2_i32 = arith.constant 2 : i32
    %0 = arith.muli %arg0, %c2_i32 : i32
    %1 = arith.addi %0, %arg1 : i32
    %c2_i32_0 = arith.constant 2 : i32
    %2 = arith.minsi %1, %c2_i32_0 : i32
    %c0_i32 = arith.constant 0 : i32
    %c0_i32_1 = arith.constant 0 : i32
    return %2, %c0_i32 : i32, i32
  }
  func.func @transform_2(%arg0: i32, %arg1: i32) -> (i32, i32) {
    %c0_i32 = arith.constant 0 : i32
    %c0_i32_0 = arith.constant 0 : i32
    %c0_i32_1 = arith.constant 0 : i32
    return %c0_i32, %c0_i32_0 : i32, i32
  }
  func.func @transform_3(%arg0: i32, %arg1: i32) -> (i32, i32) {
    %c0_i32 = arith.constant 0 : i32
    %c0_i32_0 = arith.constant 0 : i32
    %c0_i32_1 = arith.constant 0 : i32
    return %c0_i32, %c0_i32_0 : i32, i32
  }
  func.func @transform_4(%arg0: i32, %arg1: i32) -> (i32, i32, i32) {
    %c0_i32 = arith.constant 0 : i32
    %c0_i32_0 = arith.constant 0 : i32
    %c0_i32_1 = arith.constant 0 : i32
    return %arg0, %c0_i32, %c0_i32_0 : i32, i32, i32
  }
}

</mosaic_0001>

<bundles_post_ra>
// kernel: tpu_custom_call.1
= control target key start
LH: loop header
LB: loop body
LE: loop exit
PB: predicated region body
PF: predicated region fallthrough
CT: control target
= control target key end

     0   :  { %s1753_s0 = inlined_call_operand.hbm [shape: s32[1,300], index: 0, kind: input, shape index: {}]   ;;  %s1754_s1 = inlined_call_operand.hbm [shape: f32[300,128], index: 1, kind: input, shape index: {}]   ;;  %s1755_s2 = inlined_call_operand.hbm [shape: bf16[128,128], index: 2, kind: input, shape index: {}]   ;;  %s1756_s3 = inlined_call_operand.vmem [shape: f32[1,128], index: 3, kind: input, shape index: {}]   ;;  %s1757_s4 = inlined_call_operand.hbm [shape: f32[2,8,128], index: 4, kind: output, shape index: {}]  }
   0x1   :  { %1769 = sst [smem:[#allocation20_spill]] %s1755_s2 }
   0x2   :  { %9 = vsyncpa [#allocation3], 0 }
   0x3   :  { %11 = vsyncpa [#allocation3 + $0x1], 0 }
   0x4   :  { %12 = vsyncpa [#allocation6], 0 }
   0x5   :  { %14 = vsyncpa [#allocation6 + $0x1], 0 }
   0x6   :  { %15 = vsyncpa [#allocation4], 0 }
   0x7   :  { %17 = vsyncpa [#allocation4 + $0x1], 0  ;;  %s1341_s15 = smov 0   ;;  %s1343_s16 = smov 0  }
   0x8   :  { %s1345_s17 = smov 0   ;;  %s1347_s18 = smov 0  }
   0x9   :  { %s1349_s19 = smov 0   ;;  %s1351_s20 = smov 0  }
   0xa   :  { %s1353_s21 = smov 0   ;;  %s1355_s22 = smov 0  }
   0xb   :  { %s1357_s23 = smov 0   ;;  %s1359_s24 = smov 0  }
   0xc   :  { %s1361_s25 = smov 0  }
   0xd LB: > { %1770 = sst [smem:[#allocation13_spill]] %s1282_s20  ;;  %s1397_s26 = sadd.s32 4294967295, %s1302_s25   ;;  %s1302_s25 = sphi %s1361_s25, %s23_s25   ;;  %s1298_s24 = sphi %s1359_s24, %s1798_s24   ;;  %s1294_s23 = sphi %s1357_s23, %s1797_s23   ;;  %s1290_s22 = sphi %s1355_s22, %s1796_s22   ;;  %s1286_s21 = sphi %s1353_s21, %s1795_s21   ;;  %s1282_s20 = sphi %s1351_s20, %s1794_s20   ;;  %s1278_s19 = sphi %s1349_s19, %s1803_s19   ;;  %s1274_s18 = sphi %s1347_s18, %s1802_s18   ;;  %s1270_s17 = sphi %s1345_s17, %s1801_s17   ;;  %s1266_s16 = sphi %s1343_s16, %s1800_s16   ;;  %s1262_s15 = sphi %s1341_s15, %s1799_s15  }
   0xe   : > { %1771 = sst [smem:[#allocation14_spill]] %s1294_s23  ;;  %s819_s27 = sadd.s32 4294967294, %s1302_s25  }
   0xf   : > { %1772 = sst [smem:[#allocation15_spill]] %s1298_s24  ;;  %s32_s28 = sadd.s32 1, %s1294_s23 }
  0x10   : > { %s35_s29 = sadd.s32 1, %s1298_s24  ;;  %p33_p0 = scmp.ge.s32.totalorder %s32_s28, 2 }
  0x11   : > { %s820_s30 = sshll.u32 %s1298_s24, 1  ;;  %s50_s6 = sadd.s32 1, %s1282_s20 }
  0x12   : > { %s40_s5 = sadd.s32 %s1294_s23, %s820_s30  ;;  %s1805_s28 = smov (%p33_p0, %s32_s28), 0 }
  0x13   : > { %1773 = sst [smem:[#allocation16_spill]] %s1805_s28  ;;  %s1807_s29 = smov (!%p33_p0, %s35_s29), %s1298_s24 }
  0x14   : > { %p41_p1 = scmp.lt.s32.totalorder %s40_s5, 2  ;;  %p57_p2 = scmp.ne.s32.totalorder %s1282_s20, %s1278_s19 }
  0x15   : > { %p37_p3 = scmp.ge.s32.totalorder %s1807_s29, 2  ;;  %p58_p4 = scmp.eq.s32.totalorder %s1302_s25, 0 }
  0x16   : > { %s1809_s5 = smov (!%p41_p1, %s40_s5), 2  ;;  %p63_p6 = scmp.ne.s32.totalorder %s1278_s19, %s1274_s18 }
  0x17   : > { %s1811_s29 = smov (%p37_p3, %s1807_s29), 0  ;;  %p1415_p5 = por %p58_p4, %p57_p2 }
  0x18   : > { %1774 = sst [smem:[#allocation17_spill]] %s1811_s29  ;;  %s821_s8 = sshll.u32 %s1811_s29, 1 }
  0x19   : > { %s1775_s7 = scalar_select %p1415_p5, 1, 0 }
  0x1a   : > { %p1762_p7 = scmp.eq.s32.totalorder %s1397_s26, 0  ;;  %s44_s9 = sadd.s32 %s821_s8, %s1805_s28 }
  0x1b   : > { %s149_s10 = ssub.s32 %s1298_s24, %s1811_s29  ;;  %p45_p8 = scmp.lt.s32.totalorder %s44_s9, 2 }
  0x1c   : > { %p1428_p9 = por %p1762_p7, %p63_p6  ;;  %p150_p10 = scmp.eq.s32.totalorder %s149_s10, 0 }
  0x1d   : > { %s152_s12 = sadd.s32 1, %s1270_s17  ;;  %s1813_s9 = smov (!%p45_p8, %s44_s9), 2 }
  0x1e   : > { %s1776_s11 = scalar_select %p1428_p9, 1, 0 }
  0x1f   : > { %s1434_s13 = scalar_select %p150_p10, %s1270_s17, %s152_s12  }
  0x20   : > { %s47_s14 = ssub.s32 %s1809_s5, %s1813_s9  ;;  %p162_p11 = scmp.ne.s32.totalorder %s1270_s17, %s1266_s16 }
  0x21   : > { %1777 = sst [smem:[#allocation18_spill]] %s1434_s13  ;;  %p48_p12 = scmp.eq.s32.totalorder %s47_s14, 0 }
  0x22   : > { %p163_p13 = scmp.eq.s32.totalorder %s1397_s26, 3  ;;  %p168_p0 = scmp.ne.s32.totalorder %s1266_s16, %s1262_s15 }
  0x23   : > { %p169_p1 = scmp.eq.s32.totalorder %s819_s27, 3  ;;  %p824_p4 = scmp.ge.s32.totalorder %s1302_s25, 1 }
  0x24   : > { %s1445_s18 = scalar_select %p48_p12, %s1282_s20, %s50_s6  }
  0x25   : > { %p1447_p2 = por %p163_p13, %p162_p11  ;;  %p1451_p3 = por %p169_p1, %p168_p0 }
  0x26   : > { %1778 = sst [smem:[#allocation19_spill]] %s1445_s18  ;;  %p176_p6 = scmp.lt.s32.totalorder %s1302_s25, 5 }
  0x27   : > { %s1779_s30 = scalar_select %p1447_p2, 1, 0 }
  0x28   : > { %s1780_s8 = scalar_select %p1451_p3, 1, 0 }
  0x29   : > { %p1457_p8 = pnand %p824_p4, %p176_p6  ;;  %s1304_s10 = smov [#allocation7]  }
  0x2a   : > { %s188_s12 = sshll.u32 %s1304_s10, 4  ;;  %s1783_s2 = sld [smem:[#allocation20_spill]]  ;;  %s189_s12 = int_to_ptr.vmem [resolvable:$true] %s188_s12 }
  0x2b   : > { %s1781_s9 = scalar_select %p1457_p8, 1, 0 }
  0x2c   : > { %p972_p10 = pneg %p1457_p8 }
  0x2e   : > { %p1465_p11 = pnand %p972_p10, %p1762_p7 }
  0x30   : > { %s1088_s29 = scalar_lea.hbm %s1783_s2, 1024  ;;  %p1090_p13 = pneg %p1465_p11 }
  0x31   : > { %p1089_p12 = scmp.ne.s32.totalorder %s1783_s2, %s1088_s29  ;;  %p1095_p4 = scmp.lt.u32.totalorder %s1088_s29, %s1783_s2 }
  0x33   : > { %p1091_p0 = pnand %p1090_p13, %p1089_p12 }
  0x35   : > { %p1092_p1 = pneg %p1091_p0 }
  0x37   : > { %p1097_p6 = pnand %p1095_p4, %p1092_p1 }
  0x39   : > { %1100 = shalt.err (!%p1097_p6)
}
  0x3a   : > { %s1101_s18 = scalar_lea.vmem %s189_s12, 1024  ;;  %p1109_p2 = scmp.lt.s32.totalorder %s189_s12, %s189_s12 }
  0x3b   : > { %p1102_p10 = scmp.ne.s32.totalorder %s189_s12, %s1101_s18  ;;  %p1110_p9 = scmp.lt.s32.totalorder %s1101_s18, %s1101_s18 }
  0x3d   : > { %p1104_p7 = pnand %p1102_p10, %p1090_p13  ;;  %p1111_p8 = por %p1110_p9, %p1109_p2 }
  0x3f   : > { %p1105_p3 = pneg %p1104_p7 }
  0x41   : > { %p1112_p5 = pnand %p1111_p8, %p1105_p3 }
  0x43   : > { %1115 = shalt.err (!%p1112_p5)
}
  0x44   : > { %s1305_s24 = smov 64   ;;  %s1306_s28 = smov 4  }
  0x45   : > { %975 = dma.hbm_to_vmem [thread:$0]  (!%p1465_p11), %s1783_s2, 1024, %s189_s12, [#allocation6], %s1305_s24, %s1305_s24, %s1306_s28  }
  0x46   : > { %p826_p12 = scmp.ge.s32.totalorder %s1302_s25, 4 }
  0x47   : > { %s1487_s23 = sand.u32 (!%p826_p12), 1, %s1282_s20   ;;  %s1768_s29 = sshll.u32 (!%p826_p12), %s1809_s5, 4 }
  0x48   : > { %201 = sbr.rel (%p826_p12) target bundleno = 132 (0x84), region = 24  ;;  %s1495_s27 = scalar_lea.hbm (!%p826_p12), %s1753_s0, %s1768_s29 }
  0x49   : > { %s208_s12 = scalar_lea.vmem (!%p826_p12), [#allocation2], %s1487_s23  ;;  %s206_s28 = scalar_lea.sflag (!%p826_p12), [#allocation3], %s1487_s23 }
  0x4a   : > { %s219_s24 = sshll.u32 (!%p826_p12), %s208_s12, 4  ;;  %s1116_s6 = scalar_lea.hbm (!%p826_p12), %s1495_s27, 16  ;;  %s220_s24 = int_to_ptr.vmem [resolvable:$true] %s219_s24 }
  0x4b   : > { %p1117_p5 = scmp.ne.s32.totalorder (!%p826_p12), %s1495_s27, %s1116_s6  ;;  %p1784_p7 = scmp.ne.s32.totalorder (!%p826_p12), %s1775_s7, 0 }
  0x4c   : > { %s1120_s20 = scalar_lea.hbm (!%p826_p12), %s1753_s0, 48  ;;  %p1121_p3 = scmp.lt.u32.totalorder (!%p826_p12), %s1495_s27, %s1753_s0 }
  0x4d   : > { %p1118_p9 = pnand (!%p826_p12), %p1117_p5, %p1784_p7  ;;  %p1122_p8 = scmp.lt.u32.totalorder (!%p826_p12), %s1120_s20, %s1116_s6 }
  0x4e   : > { %p1124_p13 = scmp.lt.u32.totalorder (!%p826_p12), %s1116_s6, %s1495_s27 }
  0x4f   : > { %p1119_p2 = pneg %p1118_p9  ;;  %p1123_p11 = por %p1122_p8, %p1121_p3 }
  0x51   : > { %p1125_p0 = por %p1124_p13, %p1123_p11 }
  0x53   : > { %p1126_p1 = pnand %p1125_p0, %p1119_p2 }
  0x55   : > { %1129 = shalt.err (!%p1126_p1)
}
  0x56   : > { %s1130_s12 = scalar_lea.vmem %s220_s24, 16  ;;  %s1307_s29 = smov [#allocation2]  }
  0x57   : > { %p1131_p4 = scmp.ne.s32.totalorder %s220_s24, %s1130_s12  ;;  %s1134_s13 = sshll.u32 %s1307_s29, 4  ;;  %s1135_s13 = int_to_ptr.vmem [resolvable:$false] %s1134_s13 }
  0x58   : > { %s1136_s2 = scalar_lea.vmem %s1135_s13, 32  ;;  %p1137_p12 = scmp.lt.s32.totalorder %s220_s24, %s1135_s13 }
  0x59   : > { %p1132_p6 = pnand %p1131_p4, %p1784_p7  ;;  %p1138_p5 = scmp.lt.s32.totalorder %s1136_s2, %s1130_s12 }
  0x5b   : > { %p1133_p10 = pneg %p1132_p6  ;;  %p1139_p9 = por %p1138_p5, %p1137_p12 }
  0x5d   : > { %p1140_p3 = pnand %p1139_p9, %p1133_p10 }
  0x5f   : > { %1143 = shalt.err (!%p1140_p3)
}
  0x60   : > { %965 = dma.hbm_to_vmem [thread:$0]  (%p1784_p7), %s1495_s27, 16, %s220_s24, %s206_s28  }
  0x61   : > { %225 = sbr.rel (!%p1784_p7) target bundleno = 132 (0x84), region = 32  ;;  %s226_s20 = sand.u32 (%p1784_p7), 1, %s1302_s25  }
  0x62   : > { %s829_s6 = sshll.u32 (%p1784_p7), %s1487_s23, 7  ;;  %s1785_s29 = sshll.u32 (%p1784_p7), %s1809_s5, 4 }
  0x63   : > { %s236_s14 = ssub.s32 (%p1784_p7), 38, %s1785_s29  ;;  %s1525_s10 = scalar_lea.sflag (%p1784_p7), [#allocation6], %s226_s20 }
  0x64   : > { %p237_p2 = scmp.lt.s32.totalorder (%p1784_p7), %s236_s14, 16  ;;  %s230_s27 = scalar_lea.vmem (%p1784_p7), [#allocation5], %s829_s6 }
  0x68   : > { %s1815_s14 = smov (!%p237_p2, %s236_s14), 16 }
  0x69   : > { %s1522_s13 = sshll.u32 %s1815_s14, 7 }
  0x6a   : > { %s241_s18 = ssub.s32 2048, %s1522_s13 }
  0x6b   : > { %242 = vsyncadd %s1525_s10, %s241_s18  ;;  %p833_p7 = scmp.ne.s32.totalorder %s1522_s13, 0  ;;  %s885_s7 = sshll.u32 %s1809_s5, 11 }
  0x6c   : > { %s1533_s28 = scalar_lea.hbm %s1754_s1, %s885_s7  ;;  %s247_s12 = sshll.u32 %s230_s27, 4  ;;  %s1535_s12 = int_to_ptr.vmem [resolvable:$true] %s247_s12 }
  0x6d   : > { %s1144_s2 = scalar_lea.hbm %s1533_s28, %s1522_s13  ;;  %s1148_s5 = scalar_lea.hbm %s1754_s1, 4864 }
  0x6e   : > { %p1145_p8 = scmp.ne.s32.totalorder %s1533_s28, %s1144_s2  ;;  %p1149_p0 = scmp.lt.u32.totalorder %s1533_s28, %s1754_s1 }
  0x6f   : > { %p1150_p1 = scmp.lt.u32.totalorder %s1148_s5, %s1144_s2  ;;  %p1152_p6 = scmp.lt.u32.totalorder %s1144_s2, %s1533_s28 }
  0x70   : > { %p1146_p11 = pnand %p1145_p8, %p833_p7 }
  0x71   : > { %p1151_p4 = por %p1150_p1, %p1149_p0 }
  0x72   : > { %p1147_p13 = pneg %p1146_p11 }
  0x73   : > { %p1153_p10 = por %p1152_p6, %p1151_p4 }
  0x75   : > { %p1154_p12 = pnand %p1153_p10, %p1147_p13 }
  0x77   : > { %1157 = shalt.err (!%p1154_p12)
}
  0x78   : > { %s1158_s18 = scalar_lea.vmem %s1535_s12, %s1522_s13  ;;  %s1308_s27 = smov [#allocation5]  }
  0x79   : > { %p1159_p5 = scmp.ne.s32.totalorder %s1535_s12, %s1158_s18  ;;  %s1162_s7 = sshll.u32 %s1308_s27, 4  ;;  %s1163_s7 = int_to_ptr.vmem [resolvable:$false] %s1162_s7 }
  0x7a   : > { %s1164_s23 = scalar_lea.vmem %s1163_s7, 4096  ;;  %p1165_p2 = scmp.lt.s32.totalorder %s1535_s12, %s1163_s7 }
  0x7b   : > { %p1160_p9 = pnand %p1159_p5, %p833_p7  ;;  %p1166_p8 = scmp.lt.s32.totalorder %s1164_s23, %s1158_s18 }
  0x7d   : > { %p1161_p3 = pneg %p1160_p9  ;;  %p1167_p11 = por %p1166_p8, %p1165_p2 }
  0x7f   : > { %p1168_p0 = pnand %p1167_p11, %p1161_p3 }
  0x81   : > { %1171 = shalt.err (!%p1168_p0)
}
  0x82   : > { %s1309_s24 = smov 128   ;;  %s1310_s2 = smov 8  }
  0x83   : > { %253 = dma.hbm_to_vmem [thread:$0]  (%p833_p7), %s1533_s28, %s1522_s13, %s1535_s12, %s1525_s10, %s1309_s24, %s1309_s24, %s1310_s2  }
  0x84 PF: > { %p1786_p13 = scmp.ne.s32.totalorder %s1781_s9, 0 }
  0x85   : > { %s1565_s20 = sand.u32 (!%p1786_p13), 1, %s1278_s19   ;;  %p1787_p1 = scmp.ne.s32.totalorder (!%p1786_p13), %s1776_s11, 0 }
  0x86   : > { %259 = sbr.rel (%p1786_p13) target bundleno = 670 (0x29e), region = 36  ;;  %s262_s6 = scalar_lea.sflag (!%p1786_p13), [#allocation3], %s1565_s20 }
  0x87   : > { %s264_s5 = scalar_lea.vmem (!%p1786_p13), [#allocation2], %s1565_s20 }
  0x8d   : > { %1245 = dma.done.wait (%p1787_p1), %s262_s6, 16  }
  0x8e   : > { %1247 = vsyncadd (%p1787_p1), %s262_s6, 4294967280  ;;  %s269_s13 = sand.u32 1, %s1397_s26   ;;  %s838_s10 = sshll.u32 %s1565_s20, 7 }
  0x8f   : > { %s270_s9 = scalar_lea.sflag [#allocation6], %s269_s13  ;;  %s1575_s28 = scalar_lea.vmem [#allocation5], %s838_s10 }
  0x90   : > { %1249 = dma.done.wait (%p1787_p1), %s270_s9, 2048  }
  0x91   : > { %1251 = vsyncadd (%p1787_p1), %s270_s9, 4294965248  ;;  %p1788_p7 = scmp.eq.s32.totalorder %s1397_s26, 0 }
  0x93   : > { %1253 = dma.done.wait (%p1788_p7), [#allocation6], 1024   ;;  %p1789_p4 = pmov %p1788_p7 }
  0x94   : > { %s303_s12 = sand.u32 1, %s1266_s16   ;;  %p841_p6 = scmp.ne.s32.totalorder %s1286_s21, 0 }
  0x95   : > { %1255 = vsyncadd (%p1789_p4), [#allocation6], 4294966272  ;;  %s840_s29 = sshll.u32 %s303_s12, 3  ;;  %v1311_v0 = vmov (!%p841_p6), 0.0  }
  0x96   : > { %s1588_s14 = scalar_lea.vmem [#allocation8], %s840_s29  ;;  %323 = sbr.rel (%p841_p6) target bundleno = 157 (0x9d), region = 52 }
  0x97   : > { %324 = vst [vmem:[%s1588_s14] sm:$0xff] (!%p841_p6), %v1311_v0 }
  0x9d PF: > { %v1080_v1 = vld [vmem:[#allocation7] sm:$0xff]   ;;  %v1081_v2 = vld [vmem:[#allocation7 + $0x8] sm:$0xff]   ;;  %v1082_v3 = vld [vmem:[#allocation7 + $0x10] sm:$0xff]   ;;  %v1312_v33 = vmov 0.0   ;;  %vm1313_vm0 = vmmov 0   ;;  %s842_s26 = sshll.u32 %s1290_s22, 1  ;;  %v536_v34 = vlaneseq }
  0x9e   : > { %911 = vmatprep.subr.bf16.mxu0 %v1080_v1  ;;  %v1083_v4 = vld [vmem:[#allocation7 + $0x18] sm:$0xff]   ;;  %v328_v5 = vld [vmem:[%s1575_s28] sm:$0xff]  ;;  %v329_v6 = vld [vmem:[%s1575_s28 + $0x8] sm:$0xff]  ;;  %943 = vmatprep.subr.bf16.mxu1 %v1312_v33  ;;  %s326_s11 = sadd.s32 %s1286_s21, %s842_s26  ;;  %s882_s21 = sshll.u32 %s1290_s22, 7 }
  0x9f   : > { %912 = vmatpush3.bf16.msra.mxu0 %v1080_v1  ;;  %v344_v7 = vpack.c.bf16 %v329_v6, %v328_v5  ;;  %v1084_v8 = vld [vmem:[#allocation7 + $0x20] sm:$0xff]   ;;  %v1085_v9 = vld [vmem:[#allocation7 + $0x28] sm:$0xff]   ;;  %v1086_v10 = vld [vmem:[#allocation7 + $0x30] sm:$0xff]   ;;  %959 = vmatprep.mubr.msk.bf16.mxu1 %vm1313_vm0, %v1312_v33  ;;  %v1612_v35 = vshrl.u32 %v536_v34, 7  ;;  %s843_s18 = sshll.u32 %s326_s11, 7  ;;  %s708_s23 = sshll.u32 %s1588_s14, 4  ;;  %s1690_s23 = int_to_ptr.vmem [resolvable:$true] %s708_s23 }
  0xa0   : > { %913 = vmatprep.subr.bf16.mxu0 %v1081_v2  ;;  %v1087_v11 = vld [vmem:[#allocation7 + $0x38] sm:$0xff]   ;;  %v330_v12 = vld [vmem:[%s1575_s28 + $0x10] sm:$0xff]  ;;  %v332_v14 = vld [vmem:[%s1575_s28 + $0x20] sm:$0xff]  ;;  %v1615_v37 = vstv %s843_s18  ;;  %s1688_s20 = scalar_lea.hbm %s1757_s4, %s882_s21  ;;  %s695_s6 = scalar_lea.sflag [#allocation4], %s303_s12 }
  0xa1   : > { %927 = vmatprep.mubr.bf16.mxu0 %v344_v7  ;;  %v331_v13 = vld [vmem:[%s1575_s28 + $0x18] sm:$0xff]  ;;  %v333_v15 = vld [vmem:[%s1575_s28 + $0x28] sm:$0xff]  ;;  %v334_v18 = vld [vmem:[%s1575_s28 + $0x30] sm:$0xff]  ;;  %v538_v36 = vadd.s32 8, %v1612_v35  ;;  %v554_v39 = vadd.s32 %v1615_v37, %v1612_v35  ;;  %v539_v42 = vadd.s32 16, %v1612_v35  ;;  %v540_v43 = vadd.s32 24, %v1612_v35 }
  0xa2   : > { %v345_v16 = vpack.c.bf16 %v331_v13, %v330_v12  ;;  %v346_v17 = vpack.c.bf16 %v333_v15, %v332_v14  ;;  %v335_v19 = vld [vmem:[%s1575_s28 + $0x38] sm:$0xff]  ;;  %v336_v20 = vld [vmem:[%s1575_s28 + $0x40] sm:$0xff]  ;;  %v337_v21 = vld [vmem:[%s1575_s28 + $0x48] sm:$0xff]  ;;  %v541_v50 = vadd.s32 32, %v1612_v35  ;;  %v542_v51 = vadd.s32 40, %v1612_v35  ;;  %s1172_s22 = scalar_lea.vmem %s1690_s23, 128 }
  0xa3   : > { %914 = vmatpush3.bf16.msra.mxu0 %v1081_v2  ;;  %v347_v22 = vpack.c.bf16 %v335_v19, %v334_v18  ;;  %v348_v23 = vpack.c.bf16 %v337_v21, %v336_v20  ;;  %v338_v24 = vld [vmem:[%s1575_s28 + $0x50] sm:$0xff]  ;;  %v339_v25 = vld [vmem:[%s1575_s28 + $0x58] sm:$0xff]  ;;  %v340_v26 = vld [vmem:[%s1575_s28 + $0x60] sm:$0xff]  ;;  %v555_v41 = vadd.s32 %v1615_v37, %v538_v36  ;;  %vm570_vm1 = vcmp.lt.s32.totalorder %v554_v39, 300  ;;  %p1173_p10 = scmp.ne.s32.totalorder %s1690_s23, %s1172_s22  ;;  %p1790_p12 = scmp.ne.s32.totalorder %s1779_s30, 0 }
  0xa4   : > { %915 = vmatprep.subr.bf16.mxu0 %v1082_v3  ;;  %v341_v27 = vld [vmem:[%s1575_s28 + $0x68] sm:$0xff]  ;;  %v349_v28 = vpack.c.bf16 %v339_v25, %v338_v24  ;;  %v342_v30 = vld [vmem:[%s1575_s28 + $0x70] sm:$0xff]  ;;  %v343_v31 = vld [vmem:[%s1575_s28 + $0x78] sm:$0xff]  ;;  %v556_v53 = vadd.s32 %v1615_v37, %v539_v42  ;;  %v557_v54 = vadd.s32 %v1615_v37, %v540_v43  ;;  %v558_v60 = vadd.s32 %v1615_v37, %v541_v50 }
  0xa5   : > { %v350_v29 = vpack.c.bf16 %v341_v27, %v340_v26  ;;  %v351_v32 = vpack.c.bf16 %v343_v31, %v342_v30  ;;  %v1620_v38 = vld [vmem:[%s1756_s3] ss:$0 sm:$0xff]  ;;  %vm571_vm2 = vcmp.lt.s32.totalorder %v555_v41, 300  ;;  %v559_v61 = vadd.s32 %v1615_v37, %v542_v51  ;;  %p1174_p5 = pnand %p1173_p10, %p1790_p12 }
  0xa6   : > { %vm855_vm3 = vmpackc.low %vm571_vm2, %vm570_vm1  ;;  %v543_v62 = vadd.s32 48, %v1612_v35  ;;  %vm572_vm4 = vcmp.lt.s32.totalorder %v556_v53, 300  ;;  %vm573_vm5 = vcmp.lt.s32.totalorder %v557_v54, 300  ;;  %v544_v1 = vadd.s32 56, %v1612_v35 }
  0xa7   : > { %916 = vmatpush3.bf16.msra.mxu0 %v1082_v3  ;;  %vm858_vm6 = vmpackc.low %vm573_vm5, %vm572_vm4  ;;  %vm574_vm7 = vcmp.lt.s32.totalorder %v558_v60, 300  ;;  %vm575_vm8 = vcmp.lt.s32.totalorder %v559_v61, 300  ;;  %v546_v12 = vadd.s32 72, %v1612_v35  ;;  %v547_v18 = vadd.s32 80, %v1612_v35  ;;  %p1175_p9 = pneg %p1174_p5 }
  0xa8   : > { %917 = vmatprep.subr.bf16.mxu0 %v1083_v4  ;;  %vm861_vm9 = vmpackc.low %vm575_vm8, %vm574_vm7  ;;  %v548_v19 = vadd.s32 88, %v1612_v35  ;;  %v550_v36 = vadd.s32 104, %v1612_v35 }
  0xa9   : > { %v564_v30 = vadd.s32 %v1615_v37, %v547_v18 }
  0xaa   : > { %v565_v31 = vadd.s32 %v1615_v37, %v548_v19 }
  0xab   : > { %918 = vmatpush3.bf16.msra.mxu0 %v1083_v4  ;;  %vm580_vm0 = vcmp.lt.s32.totalorder %v564_v30, 300 }
  0xac   : > { %919 = vmatprep.subr.bf16.mxu0 %v1084_v8  ;;  %vm581_vm1 = vcmp.lt.s32.totalorder %v565_v31, 300 }
  0xad   : > { %vm870_vm2 = vmpackc.low %vm581_vm1, %vm580_vm0 }
  0xaf   : > { %920 = vmatpush3.bf16.msra.mxu0 %v1084_v8  ;;  %v560_v8 = vadd.s32 %v1615_v37, %v543_v62 }
  0xb0   : > { %921 = vmatprep.subr.bf16.mxu0 %v1085_v9 }
  0xb1   : > { %vm576_vm10 = vcmp.lt.s32.totalorder %v560_v8, 300 }
  0xb3   : > { %922 = vmatpush3.bf16.msra.mxu0 %v1085_v9 }
  0xb4   : > { %923 = vmatprep.subr.bf16.mxu0 %v1086_v10 }
  0xb7   : > { %924 = vmatpush3.bf16.msra.mxu0 %v1086_v10  ;;  %v561_v10 = vadd.s32 %v1615_v37, %v544_v1  ;;  %v643_v1 = vld [vmem:[%s1588_s14] sm:$0xff] }
  0xb8   : > { %925 = vmatprep.subr.bf16.mxu0 %v1087_v11 }
  0xb9   : > { %vm577_vm11 = vcmp.lt.s32.totalorder %v561_v10, 300 }
  0xba   : > { %vm864_vm12 = vmpackc.low %vm577_vm11, %vm576_vm10 }
  0xbb   : > { %926 = vmatpush3.bf16.msra.mxu0 %v1087_v11  ;;  %v545_v11 = vadd.s32 64, %v1612_v35 }
  0xbe   : > { %928 = vmatmul.mubr.bf16.vlgmr.msra.gmra.mrb[0].mxu0 %v345_v16 }
  0xbf   : > { %931 = vmatprep.mubr.bf16.mxu0 %v346_v17 }
  0xc6   : > { %932 = vmatmul.mubr.bf16.gmra.mrb[4].mxu0 %v347_v22  ;;  %v562_v22 = vadd.s32 %v1615_v37, %v545_v11 }
  0xc7   : > { %935 = vmatprep.mubr.bf16.mxu0 %v348_v23  ;;  %v563_v23 = vadd.s32 %v1615_v37, %v546_v12 }
  0xc8   : > { %vm578_vm13 = vcmp.lt.s32.totalorder %v562_v22, 300 }
  0xc9   : > { %vm579_vm14 = vcmp.lt.s32.totalorder %v563_v23, 300 }
  0xca   : > { %vm867_vm15 = vmpackc.low %vm579_vm14, %vm578_vm13 }
  0xce   : > { %936 = vmatmul.mubr.bf16.gmra.mrb[8].mxu0 %v349_v28 }
  0xcf   : > { %939 = vmatprep.mubr.bf16.mxu0 %v350_v29 }
  0xd6   : > { %940 = vmatmul.mubr.bf16.gmra.mrb[12].mxu0 %v351_v32  ;;  %v549_v32 = vadd.s32 96, %v1612_v35 }
 0x191   : > { %v929_v40 = vpop.f32.mrb[0].mxu0 }
 0x192   : > { %v466_v44 = vadd.f32 %v929_v40, %v1620_v38  ;;  %v457_v45 = vpop.f32.mrb[1].mxu0 }
 0x193   : > { %v458_v46 = vadd.f32 %v1620_v38, %v457_v45  ;;  %v930_v47 = vpop.f32.mrb[2].mxu0 }
 0x194   : > { %v469_v48 = vadd.f32 %v930_v47, %v1620_v38  ;;  %v460_v49 = vpop.f32.mrb[3].mxu0  ;;  %v522_v55 = vmax.f32 %v466_v44, 0.0  ;;  %v566_v44 = vadd.s32 %v1615_v37, %v549_v32  ;;  %v567_v47 = vadd.s32 %v1615_v37, %v550_v36 }
 0x195   : > { %v461_v52 = vadd.f32 %v1620_v38, %v460_v49  ;;  %v520_v57 = vmax.f32 %v458_v46, 0.0  ;;  %v552_v49 = vadd.s32 120, %v1612_v35 }
 0x196   : > { %v523_v56 = vmax.f32 %v469_v48, 0.0  ;;  %v551_v48 = vadd.s32 112, %v1612_v35  ;;  %vm583_vm4 = vcmp.lt.s32.totalorder %v567_v47, 300 }
 0x197   : > { %v521_v58 = vmax.f32 %v461_v52, 0.0 }
 0x198   : > { %v859_v59 = vpack.c.bf16 %v523_v56, %v522_v55 }
 0x199   : > { %v856_v63 = vpack.c.bf16 %v521_v58, %v520_v57  ;;  %v933_v0 = vpop.f32.mrb[4].mxu0  ;;  %v568_v57 = vadd.s32 %v1615_v37, %v551_v48  ;;  %v569_v58 = vadd.s32 %v1615_v37, %v552_v49  ;;  %v1314_v37 = vmov 1.0|1.0  }
 0x19a   : > { %v482_v2 = vadd.f32 %v933_v0, %v1620_v38  ;;  %v473_v3 = vpop.f32.mrb[5].mxu0 }
 0x19b   : > { %v474_v4 = vadd.f32 %v1620_v38, %v473_v3  ;;  %v934_v5 = vpop.f32.mrb[6].mxu0  ;;  %944 = vmatpush3.bf16.msk.msra.mxu1 %vm855_vm3, %v856_v63  ;;  %vm582_vm3 = vcmp.lt.s32.totalorder %v566_v44, 300  ;;  %vm585_vm7 = vcmp.lt.s32.totalorder %v569_v58, 300 }
 0x19c   : > { %v485_v6 = vadd.f32 %v934_v5, %v1620_v38  ;;  %v476_v7 = vpop.f32.mrb[7].mxu0  ;;  %945 = vmatprep.subr.bf16.mxu1 %v1312_v33  ;;  %v526_v13 = vmax.f32 %v482_v2, 0.0  ;;  %vm873_vm5 = vmpackc.low %vm583_vm4, %vm582_vm3 }
 0x19d   : > { %v477_v9 = vadd.f32 %v1620_v38, %v476_v7  ;;  %v524_v15 = vmax.f32 %v474_v4, 0.0 }
 0x19e   : > { %v527_v14 = vmax.f32 %v485_v6, 0.0 }
 0x19f   : > { %v525_v16 = vmax.f32 %v477_v9, 0.0  ;;  %946 = vmatpush3.bf16.msk.msra.mxu1 %vm858_vm6, %v859_v59  ;;  %vm584_vm6 = vcmp.lt.s32.totalorder %v568_v57, 300 }
 0x1a0   : > { %v865_v17 = vpack.c.bf16 %v527_v14, %v526_v13  ;;  %947 = vmatprep.subr.bf16.mxu1 %v1312_v33  ;;  %vm876_vm8 = vmpackc.low %vm585_vm7, %vm584_vm6 }
 0x1a1   : > { %v862_v20 = vpack.c.bf16 %v525_v16, %v524_v15  ;;  %v937_v21 = vpop.f32.mrb[8].mxu0 }
 0x1a2   : > { %v498_v24 = vadd.f32 %v937_v21, %v1620_v38  ;;  %v489_v25 = vpop.f32.mrb[9].mxu0 }
 0x1a3   : > { %v490_v26 = vadd.f32 %v1620_v38, %v489_v25  ;;  %v938_v27 = vpop.f32.mrb[10].mxu0  ;;  %948 = vmatpush3.bf16.msk.msra.mxu1 %vm861_vm9, %v862_v20 }
 0x1a4   : > { %v501_v28 = vadd.f32 %v938_v27, %v1620_v38  ;;  %v492_v29 = vpop.f32.mrb[11].mxu0  ;;  %949 = vmatprep.subr.bf16.mxu1 %v1312_v33  ;;  %v530_v39 = vmax.f32 %v498_v24, 0.0 }
 0x1a5   : > { %v493_v34 = vadd.f32 %v1620_v38, %v492_v29  ;;  %v528_v41 = vmax.f32 %v490_v26, 0.0 }
 0x1a6   : > { %v531_v40 = vmax.f32 %v501_v28, 0.0 }
 0x1a7   : > { %v529_v42 = vmax.f32 %v493_v34, 0.0  ;;  %950 = vmatpush3.bf16.msk.msra.mxu1 %vm864_vm12, %v865_v17 }
 0x1a8   : > { %v871_v43 = vpack.c.bf16 %v531_v40, %v530_v39  ;;  %951 = vmatprep.subr.bf16.mxu1 %v1312_v33 }
 0x1a9   : > { %v868_v45 = vpack.c.bf16 %v529_v42, %v528_v41  ;;  %v941_v46 = vpop.f32.mrb[12].mxu0 }
 0x1aa   : > { %v514_v50 = vadd.f32 %v941_v46, %v1620_v38  ;;  %v505_v51 = vpop.f32.mrb[13].mxu0 }
 0x1ab   : > { %v506_v52 = vadd.f32 %v1620_v38, %v505_v51  ;;  %v942_v53 = vpop.f32.mrb[14].mxu0  ;;  %952 = vmatpush3.bf16.msk.msra.mxu1 %vm867_vm15, %v868_v45 }
 0x1ac   : > { %v517_v54 = vadd.f32 %v942_v53, %v1620_v38  ;;  %v508_v55 = vpop.f32.mrb[15].mxu0  ;;  %953 = vmatprep.subr.bf16.mxu1 %v1312_v33  ;;  %v534_v59 = vmax.f32 %v514_v50, 0.0 }
 0x1ad   : > { %v509_v56 = vadd.f32 %v1620_v38, %v508_v55  ;;  %v532_v61 = vmax.f32 %v506_v52, 0.0  ;;  %v853_v38 = vld [vmem:[%s264_s5] ss:$0 sm:$0xff]  ;;  %s1315_s5 = smov [#allocation8]  }
 0x1ae   : > { %v535_v60 = vmax.f32 %v517_v54, 0.0  ;;  %vm639_vm9 = vcmp.eq.s32.totalorder %v1612_v35, %v853_v38  ;;  %s1176_s13 = sshll.u32 %s1315_s5, 4  ;;  %s1177_s13 = int_to_ptr.vmem [resolvable:$false] %s1176_s13 }
 0x1af   : > { %v533_v62 = vmax.f32 %v509_v56, 0.0  ;;  %954 = vmatpush3.bf16.msk.msra.mxu1 %vm870_vm2, %v871_v43  ;;  %vm879_vm10 = vmpackc.low %vm639_vm9, %vm639_vm9  ;;  %s1178_s10 = scalar_lea.vmem %s1177_s13, 256  ;;  %p1179_p3 = scmp.lt.s32.totalorder %s1690_s23, %s1177_s13 }
 0x1b0   : > { %v877_v63 = vpack.c.bf16 %v535_v60, %v534_v59  ;;  %955 = vmatprep.subr.bf16.mxu1 %v1312_v33  ;;  %p1180_p2 = scmp.lt.s32.totalorder %s1178_s10, %s1172_s22 }
 0x1b1   : > { %v874_v0 = vpack.c.bf16 %v533_v62, %v532_v61 }
 0x1b2   : > { %p1181_p8 = por %p1180_p2, %p1179_p3 }
 0x1b3   : > { %956 = vmatpush3.bf16.msk.msra.mxu1 %vm873_vm5, %v874_v0 }
 0x1b4   : > { %957 = vmatprep.subr.bf16.mxu1 %v1312_v33  ;;  %p1182_p11 = pnand %p1181_p8, %p1175_p9 }
 0x1b7   : > { %958 = vmatpush3.bf16.msk.msra.mxu1 %vm876_vm8, %v877_v63 }
 0x1ba   : > { %960 = vmatmul.mubr.msk.bf16.vlgmr.msra.gmra.mrb[0].mxu1 %vm879_vm10, %v1314_v37 }
 0x28d   : > { %v686_v2 = vpop.f32.mrb[0].mxu1 }
 0x28e   : > { %v692_v3 = vadd.f32 %v686_v2, %v643_v1  ;;  %v961_v4 = vpop.f32.mrb[1].mxu1 }
 0x28f   : > { %v689_v33 = vpop.f32.mrb[2].mxu1 }
 0x290   : > { %693 = vst [vmem:[%s1588_s14] sm:$0xff] %v692_v3  ;;  %v962_v35 = vpop.f32.mrb[3].mxu1 }
 0x291   : > { %1185 = shalt.err (!%p1182_p11)
}
 0x292   : > { %s1186_s9 = scalar_lea.hbm %s1688_s20, 128  ;;  %s1190_s29 = scalar_lea.hbm %s1757_s4, 256 }
 0x293   : > { %p1187_p0 = scmp.ne.s32.totalorder %s1688_s20, %s1186_s9  ;;  %p1191_p7 = scmp.lt.u32.totalorder %s1688_s20, %s1757_s4 }
 0x294   : > { %p1192_p4 = scmp.lt.u32.totalorder %s1190_s29, %s1186_s9  ;;  %p1194_p10 = scmp.lt.u32.totalorder %s1186_s9, %s1688_s20 }
 0x295   : > { %p1188_p13 = pnand %p1187_p0, %p1790_p12 }
 0x296   : > { %p1193_p6 = por %p1192_p4, %p1191_p7 }
 0x297   : > { %p1189_p1 = pneg %p1188_p13 }
 0x298   : > { %p1195_p5 = por %p1194_p10, %p1193_p6 }
 0x29a   : > { %p1196_p9 = pnand %p1195_p5, %p1189_p1 }
 0x29c   : > { %1199 = shalt.err (!%p1196_p9)
}
 0x29d   : > { %970 = dma.vmem_to_hbm [thread:$0]  (%p1790_p12), %s1690_s23, 128, %s1688_s20, %s695_s6  }
 0x29e PF: > { %p982_p3 = scmp.ge.s32.totalorder %s1302_s25, 2  ;;  %s720_s11 = sand.u32 1, %s1262_s15  }
 0x29f   : > { %p1791_p2 = scmp.ne.s32.totalorder %s1780_s8, 0  ;;  %s721_s18 = scalar_lea.sflag [#allocation4], %s720_s11 }
 0x2a1   : > { %p977_p8 = pnand %p982_p3, %p1791_p2 }
 0x2a3   : > { %1257 = dma.done.wait (!%p977_p8), %s721_s18, 128  }
 0x2a4   : > { %1259 = vsyncadd (!%p977_p8), %s721_s18, 4294967168  ;;  %s23_s25 = sadd.s32 1, %s1302_s25   ;;  %s1792_s30 = sld [smem:[#allocation18_spill]] }
 0x2a5   : > { %p20_p11 = scmp.ge.s32.totalorder %s23_s25, 6   ;;  %s1793_s27 = sld [smem:[#allocation13_spill]] }
 0x2a6   : > { %s1794_s20 = sld [smem:[#allocation19_spill]]  ;;  %s1795_s21 = sld [smem:[#allocation14_spill]] }
 0x2a7   : > { %s1796_s22 = sld [smem:[#allocation15_spill]]  ;;  %s1797_s23 = sld [smem:[#allocation16_spill]] }
 0x2a8   : > { %s1798_s24 = sld [smem:[#allocation17_spill]]  ;;  %s1799_s15 = smov %s1266_s16 }
 0x2a9   : > { %s1800_s16 = smov %s1270_s17  ;;  %s1802_s18 = smov %s1278_s19 }
 0x2aa   : > { %s1801_s17 = smov %s1792_s30  ;;  %22 = sbr.rel (!%p20_p11) target bundleno = 13 (0xd), region = 102 }
 0x2ab   : > { %s1803_s19 = smov %s1793_s27 }
 0x2b1   :  { %726 = vsyncpa [#allocation3], 1 }
 0x2b2   :  { %728 = vsyncpa [#allocation3 + $0x1], 1 }
 0x2b3   :  { %729 = vsyncpa [#allocation6], 1 }
 0x2b4   :  { %731 = vsyncpa [#allocation6 + $0x1], 1 }
 0x2b5   :  { %732 = vsyncpa [#allocation4], 1 }
 0x2b6   :  { %734 = vsyncpa [#allocation4 + $0x1], 1 }

</bundles_post_ra>
